<compile_context>
chip_gen: v7x
topology: tpu7x:2x2x1
jax: 0.10.0
libtpu: 0.0.40
codegen_flags: <defaults>
</compile_context>

<pallas_src>
import functools

import jax
import jax.numpy as jnp
from jax.experimental import pallas as pl
from jax.experimental.pallas import tpu as pltpu

EPS = 1e-5
LANE = 128
SUBLANE = 8


def _round_up(n, m):
    return ((n + m - 1) // m) * m


def _make_kernel(hp, np_pad, b_real, b_pad):
    """Fused kernel for padded hidden width `hp`, output width `np_pad`,
    real batch `b_real`, padded batch `b_pad`."""
    inv_b = 1.0 / float(b_real)
    use_mask = b_pad != b_real

    if not use_mask:
        # Fast path: batch already sublane-aligned, no row masking needed.
        def kernel(x_ref, w1_ref, w2_ref, w3_ref, p_ref, o_ref):
            x = x_ref[...]            # [B, Dp]   bf16
            p = p_ref[...]            # [8, P]    f32  (packed small params)
            g1, be1 = p[0:1, :hp], p[1:2, :hp]
            g2, be2 = p[2:3, :hp], p[3:4, :hp]
            b3 = p[4:5, :np_pad]

            # ---- Linear 1 (bias cancelled by batch-stats BN) + BN + ReLU ----
            h = jnp.dot(x, w1_ref[...], preferred_element_type=jnp.float32)
            mu = jnp.sum(h, axis=0, keepdims=True) * inv_b
            hc = h - mu
            var = jnp.sum(hc * hc, axis=0, keepdims=True) * inv_b
            h = jnp.maximum(hc * (g1 * jax.lax.rsqrt(var + EPS)) + be1, 0.0)

            # ---- Linear 2 + BN + ReLU ----
            h = jnp.dot(h.astype(jnp.bfloat16), w2_ref[...],
                        preferred_element_type=jnp.float32)
            mu = jnp.sum(h, axis=0, keepdims=True) * inv_b
            hc = h - mu
            var = jnp.sum(hc * hc, axis=0, keepdims=True) * inv_b
            h = jnp.maximum(hc * (g2 * jax.lax.rsqrt(var + EPS)) + be2, 0.0)

            # ---- Linear 3 (lane-dense padded output) ----
            o_ref[...] = (
                jnp.dot(h.astype(jnp.bfloat16), w3_ref[...],
                        preferred_element_type=jnp.float32) + b3
            ).astype(o_ref.dtype)

        return kernel

    # Masked path: padded batch rows are zero on input (no bias before BN), BN
    # statistics divide by the real batch size, and the row mask keeps padded
    # rows identically zero between layers so they never pollute statistics.
    def kernel(x_ref, w1_ref, w2_ref, w3_ref, p_ref, m_ref, o_ref):
        x = x_ref[...]                # [Bp, Dp]  bf16
        p = p_ref[...]                # [8, P]    f32
        m = m_ref[...]                # [Bp, 1]   f32 (1 real row, 0 padded)
        g1, be1 = p[0:1, :hp], p[1:2, :hp]
        g2, be2 = p[2:3, :hp], p[3:4, :hp]
        b3 = p[4:5, :np_pad]

        def bn_relu(h, g, be):
            mu = jnp.sum(h, axis=0, keepdims=True) * inv_b   # padded rows are 0
            hc = (h - mu) * m                                # re-zero padded rows
            var = jnp.sum(hc * hc, axis=0, keepdims=True) * inv_b
            return jnp.maximum(hc * (g * jax.lax.rsqrt(var + EPS)) + be, 0.0) * m

        h = jnp.dot(x, w1_ref[...], preferred_element_type=jnp.float32)
        h = bn_relu(h, g1, be1)
        h = jnp.dot(h.astype(jnp.bfloat16), w2_ref[...],
                    preferred_element_type=jnp.float32)
        h = bn_relu(h, g2, be2)
        o_ref[...] = (
            jnp.dot(h.astype(jnp.bfloat16), w3_ref[...],
                    preferred_element_type=jnp.float32) + b3
        ).astype(o_ref.dtype)

    return kernel


@functools.partial(jax.jit)
def discriminator_forward(x, params):
    """x: [B, input_dim] float32. Returns [B, num_domains] float32."""
    (w1, b1, g1, be1, w2, b2, g2, be2, w3, b3) = params
    del b1, b2  # exactly cancelled by the batch-stats BatchNorm that follows

    B, D = x.shape
    H = w1.shape[1]
    N = w3.shape[1]
    Bp = _round_up(B, SUBLANE)
    Dp = _round_up(D, LANE)
    Hp = _round_up(H, LANE)
    Np = _round_up(N, LANE)
    P = max(Hp, Np)

    # Zero-pad features / weights to lane-aligned widths (exact: padded columns
    # stay identically zero through BN/ReLU because their gamma/beta are zero).
    xp = jnp.zeros((Bp, Dp), jnp.bfloat16).at[:B, :D].set(x.astype(jnp.bfloat16))
    w1p = jnp.zeros((Dp, Hp), jnp.bfloat16).at[:D, :H].set(w1.astype(jnp.bfloat16))
    w2p = jnp.zeros((Hp, Hp), jnp.bfloat16).at[:H, :H].set(w2.astype(jnp.bfloat16))
    w3p = jnp.zeros((Hp, Np), jnp.bfloat16).at[:H, :N].set(w3.astype(jnp.bfloat16))

    # Pack all remaining small per-feature params into one (8, P) array -> 1 DMA.
    packed = jnp.zeros((8, P), jnp.float32)
    packed = packed.at[0, :H].set(g1.reshape(-1))
    packed = packed.at[1, :H].set(be1.reshape(-1))
    packed = packed.at[2, :H].set(g2.reshape(-1))
    packed = packed.at[3, :H].set(be2.reshape(-1))
    packed = packed.at[4, :N].set(b3.reshape(-1))

    args = [xp, w1p, w2p, w3p, packed]
    if Bp != B:
        row_mask = (jnp.arange(Bp) < B).astype(jnp.float32).reshape(Bp, 1)
        args.append(row_mask)

    in_bytes = (xp.size + w1p.size + w2p.size + w3p.size) * 2 + packed.size * 4
    if Bp != B:
        in_bytes += Bp * 4
    out_bytes = Bp * Np * 4
    act_bytes = 2 * Bp * Hp * 4 + Bp * Np * 4
    needed = in_bytes + out_bytes + act_bytes
    vmem_limit = int(min(max(2 * needed + (2 << 20), 8 << 20), 48 << 20))

    flops = 2 * Bp * (Dp * Hp + Hp * Hp + Hp * Np)
    cost = pl.CostEstimate(
        flops=flops,
        transcendentals=2 * Hp,
        bytes_accessed=in_bytes + out_bytes,
    )

    vmem = pl.BlockSpec(memory_space=pltpu.MemorySpace.VMEM)
    out_pad = pl.pallas_call(
        _make_kernel(Hp, Np, B, Bp),
        out_shape=jax.ShapeDtypeStruct((Bp, Np), jnp.float32),
        in_specs=[vmem] * len(args),
        out_specs=vmem,
        compiler_params=pltpu.CompilerParams(vmem_limit_bytes=vmem_limit),
        cost_estimate=cost,
    )(*args)

    return out_pad[:B, :N]


def init_params(key, input_dim, hidden_dim, num_domains):
    ks = jax.random.split(key, 6)
    w1 = jax.random.normal(ks[0], (input_dim, hidden_dim), jnp.float32) * 0.1
    b1 = jax.random.normal(ks[1], (1, hidden_dim), jnp.float32) * 0.01
    g1 = jnp.ones((1, hidden_dim), jnp.float32)
    be1 = jnp.zeros((1, hidden_dim), jnp.float32)
    w2 = jax.random.normal(ks[2], (hidden_dim, hidden_dim), jnp.float32) * 0.1
    b2 = jax.random.normal(ks[3], (1, hidden_dim), jnp.float32) * 0.01
    g2 = jnp.ones((1, hidden_dim), jnp.float32)
    be2 = jnp.zeros((1, hidden_dim), jnp.float32)
    w3 = jax.random.normal(ks[4], (hidden_dim, num_domains), jnp.float32) * 0.1
    b3 = jax.random.normal(ks[5], (1, num_domains), jnp.float32) * 0.01
    return (w1, b1, g1, be1, w2, b2, g2, be2, w3, b3)


def _bn_relu(h, g, be):
    mu = jnp.mean(h, axis=0, keepdims=True)
    hc = h - mu
    var = jnp.mean(hc * hc, axis=0, keepdims=True)
    return jnp.maximum(hc * (g * jax.lax.rsqrt(var + EPS)) + be, 0.0)


def reference_forward_f32(x, params):
    """Pure-f32 PyTorch-semantics reference (biases included)."""
    (w1, b1, g1, be1, w2, b2, g2, be2, w3, b3) = params
    h = _bn_relu(x @ w1 + b1, g1, be1)
    h = _bn_relu(h @ w2 + b2, g2, be2)
    return h @ w3 + b3


def reference_forward_bf16(x, params):
    """Numerics-matched reference: bf16 MXU operands, f32 accumulation & BN."""
    (w1, b1, g1, be1, w2, b2, g2, be2, w3, b3) = params
    del b1, b2  # cancelled exactly by batch-stats BN
    h = jnp.dot(x.astype(jnp.bfloat16), w1.astype(jnp.bfloat16),
                preferred_element_type=jnp.float32)
    h = _bn_relu(h, g1, be1)
    h = jnp.dot(h.astype(jnp.bfloat16), w2.astype(jnp.bfloat16),
                preferred_element_type=jnp.float32)
    h = _bn_relu(h, g2, be2)
    return jnp.dot(h.astype(jnp.bfloat16), w3.astype(jnp.bfloat16),
                   preferred_element_type=jnp.float32) + b3


if __name__ == "__main__":
    key = jax.random.PRNGKey(0)
    batch, input_dim, hidden_dim, num_domains = 8, 32, 32, 4

    kx, kp = jax.random.split(key)
    x = jax.random.normal(kx, (batch, input_dim), jnp.float32)
    params = init_params(kp, input_dim, hidden_dim, num_domains)

    out = discriminator_forward(x, params)
    out = jax.block_until_ready(out)
    assert out.shape == (batch, num_domains)

    # Tight check against the numerics-matched (bf16-MXU, f32-BN) reference.
    ref_bf16 = reference_forward_bf16(x, params)
    assert jnp.allclose(out, ref_bf16, atol=2e-3, rtol=2e-3), (
        f"max abs diff vs matched ref: {jnp.max(jnp.abs(out - ref_bf16))}"
    )

    # Looser sanity check against the full-f32 PyTorch-semantics reference
    # (differences come only from bf16 matmul operands).
    ref_f32 = reference_forward_f32(x, params)
    assert jnp.allclose(out, ref_f32, atol=1e-1, rtol=1e-1), (
        f"max abs diff vs f32 ref: {jnp.max(jnp.abs(out - ref_f32))}"
    )

    print("KERNEL_OK")
</pallas_src>

<mosaic_0001>
module attributes {stable_mosaic.version = 11 : i64} {
  func.func @kernel(%arg0: memref<8x128xbf16, #tpu.memory_space<vmem>>, %arg1: memref<128x128xbf16, #tpu.memory_space<vmem>>, %arg2: memref<128x128xbf16, #tpu.memory_space<vmem>>, %arg3: memref<128x128xbf16, #tpu.memory_space<vmem>>, %arg4: memref<8x128xf32, #tpu.memory_space<vmem>>, %arg5: memref<8x128xf32, #tpu.memory_space<vmem>>) attributes {dimension_semantics = [], scalar_prefetch = 0 : i64, scratch_operands = 0 : i64, tpu.core_type = #tpu.core_type<tc>} {
    %c0 = arith.constant 0 : index
    %c0_0 = arith.constant 0 : index
    %0 = vector.load %arg0[%c0, %c0_0] : memref<8x128xbf16, #tpu.memory_space<vmem>>, vector<8x128xbf16>
    %c0_1 = arith.constant 0 : index
    %c0_2 = arith.constant 0 : index
    %1 = vector.load %arg4[%c0_1, %c0_2] : memref<8x128xf32, #tpu.memory_space<vmem>>, vector<8x128xf32>
    %2 = vector.extract_strided_slice %1 {offsets = [0, 0], sizes = [1, 128], strides = [1, 1]} : vector<8x128xf32> to vector<1x128xf32>
    %3 = vector.extract_strided_slice %1 {offsets = [1, 0], sizes = [1, 128], strides = [1, 1]} : vector<8x128xf32> to vector<1x128xf32>
    %4 = vector.extract_strided_slice %1 {offsets = [2, 0], sizes = [1, 128], strides = [1, 1]} : vector<8x128xf32> to vector<1x128xf32>
    %5 = vector.extract_strided_slice %1 {offsets = [3, 0], sizes = [1, 128], strides = [1, 1]} : vector<8x128xf32> to vector<1x128xf32>
    %6 = vector.extract_strided_slice %1 {offsets = [4, 0], sizes = [1, 128], strides = [1, 1]} : vector<8x128xf32> to vector<1x128xf32>
    %c0_3 = arith.constant 0 : index
    %c0_4 = arith.constant 0 : index
    %7 = vector.load %arg1[%c0_3, %c0_4] : memref<128x128xbf16, #tpu.memory_space<vmem>>, vector<128x128xbf16>
    %cst = arith.constant dense<0.000000e+00> : vector<8x128xf32>
    %8 = tpu.matmul %0, %7, %cst {dimension_numbers = #tpu.dot_dimension_numbers<[1], [0], [0], [1], [0, 0, 1, 1], [], []>} : vector<8x128xbf16>, vector<128x128xbf16>, vector<8x128xf32> -> vector<8x128xf32>
    %cst_5 = arith.constant dense<0.000000e+00> : vector<128xf32>
    %9 = vector.multi_reduction <add>, %8, %cst_5 [0] : vector<8x128xf32> to vector<128xf32>
    %10 = vector.shape_cast %9 : vector<128xf32> to vector<1x128xf32>
    %cst_6 = arith.constant 1.250000e-01 : f32
    %11 = vector.broadcast %cst_6 : f32 to vector<1x128xf32>
    %12 = arith.mulf %10, %11 : vector<1x128xf32>
    %13 = vector.broadcast %12 : vector<1x128xf32> to vector<8x128xf32>
    %14 = arith.subf %8, %13 : vector<8x128xf32>
    %15 = arith.mulf %14, %14 : vector<8x128xf32>
    %cst_7 = arith.constant dense<0.000000e+00> : vector<128xf32>
    %16 = vector.multi_reduction <add>, %15, %cst_7 [0] : vector<8x128xf32> to vector<128xf32>
    %17 = vector.shape_cast %16 : vector<128xf32> to vector<1x128xf32>
    %cst_8 = arith.constant 1.250000e-01 : f32
    %18 = vector.broadcast %cst_8 : f32 to vector<1x128xf32>
    %19 = arith.mulf %17, %18 : vector<1x128xf32>
    %cst_9 = arith.constant 9.99999974E-6 : f32
    %20 = vector.broadcast %cst_9 : f32 to vector<1x128xf32>
    %21 = arith.addf %19, %20 : vector<1x128xf32>
    %22 = math.rsqrt %21 : vector<1x128xf32>
    %23 = arith.mulf %2, %22 : vector<1x128xf32>
    %24 = vector.broadcast %23 : vector<1x128xf32> to vector<8x128xf32>
    %25 = arith.mulf %14, %24 : vector<8x128xf32>
    %26 = vector.broadcast %3 : vector<1x128xf32> to vector<8x128xf32>
    %27 = arith.addf %25, %26 : vector<8x128xf32>
    %cst_10 = arith.constant 0.000000e+00 : f32
    %28 = vector.broadcast %cst_10 : f32 to vector<8x128xf32>
    %29 = arith.maximumf %27, %28 : vector<8x128xf32>
    %30 = arith.truncf %29 : vector<8x128xf32> to vector<8x128xbf16>
    %c0_11 = arith.constant 0 : index
    %c0_12 = arith.constant 0 : index
    %31 = vector.load %arg2[%c0_11, %c0_12] : memref<128x128xbf16, #tpu.memory_space<vmem>>, vector<128x128xbf16>
    %cst_13 = arith.constant dense<0.000000e+00> : vector<8x128xf32>
    %32 = tpu.matmul %30, %31, %cst_13 {dimension_numbers = #tpu.dot_dimension_numbers<[1], [0], [0], [1], [0, 0, 1, 1], [], []>} : vector<8x128xbf16>, vector<128x128xbf16>, vector<8x128xf32> -> vector<8x128xf32>
    %cst_14 = arith.constant dense<0.000000e+00> : vector<128xf32>
    %33 = vector.multi_reduction <add>, %32, %cst_14 [0] : vector<8x128xf32> to vector<128xf32>
    %34 = vector.shape_cast %33 : vector<128xf32> to vector<1x128xf32>
    %cst_15 = arith.constant 1.250000e-01 : f32
    %35 = vector.broadcast %cst_15 : f32 to vector<1x128xf32>
    %36 = arith.mulf %34, %35 : vector<1x128xf32>
    %37 = vector.broadcast %36 : vector<1x128xf32> to vector<8x128xf32>
    %38 = arith.subf %32, %37 : vector<8x128xf32>
    %39 = arith.mulf %38, %38 : vector<8x128xf32>
    %cst_16 = arith.constant dense<0.000000e+00> : vector<128xf32>
    %40 = vector.multi_reduction <add>, %39, %cst_16 [0] : vector<8x128xf32> to vector<128xf32>
    %41 = vector.shape_cast %40 : vector<128xf32> to vector<1x128xf32>
    %cst_17 = arith.constant 1.250000e-01 : f32
    %42 = vector.broadcast %cst_17 : f32 to vector<1x128xf32>
    %43 = arith.mulf %41, %42 : vector<1x128xf32>
    %cst_18 = arith.constant 9.99999974E-6 : f32
    %44 = vector.broadcast %cst_18 : f32 to vector<1x128xf32>
    %45 = arith.addf %43, %44 : vector<1x128xf32>
    %46 = math.rsqrt %45 : vector<1x128xf32>
    %47 = arith.mulf %4, %46 : vector<1x128xf32>
    %48 = vector.broadcast %47 : vector<1x128xf32> to vector<8x128xf32>
    %49 = arith.mulf %38, %48 : vector<8x128xf32>
    %50 = vector.broadcast %5 : vector<1x128xf32> to vector<8x128xf32>
    %51 = arith.addf %49, %50 : vector<8x128xf32>
    %cst_19 = arith.constant 0.000000e+00 : f32
    %52 = vector.broadcast %cst_19 : f32 to vector<8x128xf32>
    %53 = arith.maximumf %51, %52 : vector<8x128xf32>
    %54 = arith.truncf %53 : vector<8x128xf32> to vector<8x128xbf16>
    %c0_20 = arith.constant 0 : index
    %c0_21 = arith.constant 0 : index
    %55 = vector.load %arg3[%c0_20, %c0_21] : memref<128x128xbf16, #tpu.memory_space<vmem>>, vector<128x128xbf16>
    %cst_22 = arith.constant dense<0.000000e+00> : vector<8x128xf32>
    %56 = tpu.matmul %54, %55, %cst_22 {dimension_numbers = #tpu.dot_dimension_numbers<[1], [0], [0], [1], [0, 0, 1, 1], [], []>} : vector<8x128xbf16>, vector<128x128xbf16>, vector<8x128xf32> -> vector<8x128xf32>
    %57 = vector.broadcast %6 : vector<1x128xf32> to vector<8x128xf32>
    %58 = arith.addf %56, %57 : vector<8x128xf32>
    %c0_23 = arith.constant 0 : index
    %c0_24 = arith.constant 0 : index
    %59 = vector.load %arg5[%c0_23, %c0_24] : memref<8x128xf32, #tpu.memory_space<vmem>>, vector<8x128xf32>
    tpu.vector_store %arg5[%c0_23, %c0_24], %58 {strides = array<i32>} : memref<8x128xf32, #tpu.memory_space<vmem>>, vector<8x128xf32>,
    return
  }
}

</mosaic_0001>

<bundles_post_ra>
// kernel: discriminator_forward.1
= control target key start
LH: loop header
LB: loop body
LE: loop exit
PB: predicated region body
PF: predicated region fallthrough
CT: control target
= control target key end

     0   :  { %v547_v0 = vmov 0.0   ;;  %vm548_vm0 = vmmov 0   ;;  %v146_v39 = vlaneseq  ;;  %s704_s1 = inlined_call_operand.vmem [shape: bf16[128,128], index: 1, kind: input, shape index: {}]   ;;  %s705_s0 = inlined_call_operand.vmem [shape: bf16[8,128], index: 0, kind: input, shape index: {}]   ;;  %s706_s2 = inlined_call_operand.vmem [shape: bf16[128,128], index: 2, kind: input, shape index: {}]   ;;  %s707_s4 = inlined_call_operand.vmem [shape: f32[8,128], index: 4, kind: input, shape index: {}]   ;;  %s708_s3 = inlined_call_operand.vmem [shape: bf16[128,128], index: 3, kind: input, shape index: {}]   ;;  %s709_s5 = inlined_call_operand.vmem [shape: f32[8,128], index: 5, kind: output, shape index: {}]  }
   0x1   :  { %457 = vmatprep.subr.bf16.mxu0 %v547_v0  ;;  %v519_v1 = vld [vmem:[%s704_s1] sm:$0xff]   ;;  %473 = vmatprep.mubr.msk.bf16.mxu0 %vm548_vm0, %v547_v0  ;;  %v520_v2 = vld [vmem:[%s704_s1 + $0x8] sm:$0xff]   ;;  %v521_v3 = vld [vmem:[%s704_s1 + $0x10] sm:$0xff]  }
   0x2   :  { %477 = vmatprep.subr.bf16.mxu1 %v547_v0  ;;  %493 = vmatprep.mubr.msk.bf16.mxu1 %vm548_vm0, %v547_v0  ;;  %v522_v4 = vld [vmem:[%s704_s1 + $0x18] sm:$0xff]   ;;  %v523_v5 = vld [vmem:[%s704_s1 + $0x20] sm:$0xff]   ;;  %v524_v6 = vld [vmem:[%s704_s1 + $0x28] sm:$0xff]   ;;  %v653_v40 = vshrl.u32 %v146_v39, 7 }
   0x3   :  { %458 = vmatpush3.bf16.msra.mxu0 %v519_v1  ;;  %v525_v7 = vld [vmem:[%s704_s1 + $0x30] sm:$0xff]   ;;  %v526_v8 = vld [vmem:[%s704_s1 + $0x38] sm:$0xff]   ;;  %v21_v9 = vld [vmem:[%s705_s0] sm:$0xf] }
   0x4   :  { %459 = vmatprep.subr.bf16.mxu0 %v547_v0  ;;  %v527_v10 = vld [vmem:[%s706_s2] sm:$0xff]   ;;  %v528_v11 = vld [vmem:[%s706_s2 + $0x8] sm:$0xff]   ;;  %v529_v12 = vld [vmem:[%s706_s2 + $0x10] sm:$0xff]   ;;  %v148_v42 = vsub.s32 0, %v653_v40  ;;  %v153_v43 = vsub.s32 1, %v653_v40 }
   0x5   :  { %478 = vmatpush3.bf16.msra.mxu1 %v527_v10  ;;  %v530_v13 = vld [vmem:[%s706_s2 + $0x18] sm:$0xff]   ;;  %v531_v14 = vld [vmem:[%s706_s2 + $0x20] sm:$0xff]   ;;  %v532_v15 = vld [vmem:[%s706_s2 + $0x28] sm:$0xff]  }
   0x6   :  { %479 = vmatprep.subr.bf16.mxu1 %v547_v0  ;;  %v533_v16 = vld [vmem:[%s706_s2 + $0x30] sm:$0xff]   ;;  %v534_v17 = vld [vmem:[%s706_s2 + $0x38] sm:$0xff]   ;;  %v658_v41 = vld [vmem:[%s707_s4] sm:$0xff] }
   0x7   :  { %460 = vmatpush3.bf16.msra.mxu0 %v520_v2  ;;  %v154_v47 = vrot.slane %v658_v41, %v153_v43  ;;  %v535_v52 = vld [vmem:[%s708_s3] sm:$0xff]   ;;  %v536_v53 = vld [vmem:[%s708_s3 + $0x8] sm:$0xff]   ;;  %v537_v54 = vld [vmem:[%s708_s3 + $0x10] sm:$0xff]  }
   0x8   :  { %461 = vmatprep.subr.bf16.mxu0 %v547_v0  ;;  %v538_v55 = vld [vmem:[%s708_s3 + $0x18] sm:$0xff]   ;;  %v539_v56 = vld [vmem:[%s708_s3 + $0x20] sm:$0xff]   ;;  %v540_v57 = vld [vmem:[%s708_s3 + $0x28] sm:$0xff]  }
   0x9   :  { %480 = vmatpush3.bf16.msra.mxu1 %v528_v11  ;;  %v541_v58 = vld [vmem:[%s708_s3 + $0x30] sm:$0xff]   ;;  %v542_v59 = vld [vmem:[%s708_s3 + $0x38] sm:$0xff]  }
   0xa   :  { %481 = vmatprep.subr.bf16.mxu1 %v547_v0 }
   0xb   :  { %462 = vmatpush3.bf16.msra.mxu0 %v521_v3 }
   0xc   :  { %463 = vmatprep.subr.bf16.mxu0 %v547_v0 }
   0xd   :  { %482 = vmatpush3.bf16.msra.mxu1 %v529_v12 }
   0xe   :  { %483 = vmatprep.subr.bf16.mxu1 %v547_v0 }
   0xf   :  { %464 = vmatpush3.bf16.msra.mxu0 %v522_v4 }
  0x10   :  { %465 = vmatprep.subr.bf16.mxu0 %v547_v0 }
  0x11   :  { %484 = vmatpush3.bf16.msra.mxu1 %v530_v13 }
  0x12   :  { %485 = vmatprep.subr.bf16.mxu1 %v547_v0 }
  0x13   :  { %466 = vmatpush3.bf16.msra.mxu0 %v523_v5 }
  0x14   :  { %467 = vmatprep.subr.bf16.mxu0 %v547_v0 }
  0x15   :  { %486 = vmatpush3.bf16.msra.mxu1 %v531_v14 }
  0x16   :  { %487 = vmatprep.subr.bf16.mxu1 %v547_v0 }
  0x17   :  { %468 = vmatpush3.bf16.msra.mxu0 %v524_v6 }
  0x18   :  { %469 = vmatprep.subr.bf16.mxu0 %v547_v0 }
  0x19   :  { %488 = vmatpush3.bf16.msra.mxu1 %v532_v15 }
  0x1a   :  { %489 = vmatprep.subr.bf16.mxu1 %v547_v0 }
  0x1b   :  { %470 = vmatpush3.bf16.msra.mxu0 %v525_v7 }
  0x1c   :  { %471 = vmatprep.subr.bf16.mxu0 %v547_v0 }
  0x1d   :  { %490 = vmatpush3.bf16.msra.mxu1 %v533_v16 }
  0x1e   :  { %491 = vmatprep.subr.bf16.mxu1 %v547_v0 }
  0x1f   :  { %472 = vmatpush3.bf16.msra.mxu0 %v526_v8 }
  0x20   :  { %497 = vmatprep.subr.bf16.mxu0 %v547_v0 }
  0x21   :  { %492 = vmatpush3.bf16.msra.mxu1 %v534_v17  ;;  %v283_v17 = vsub.s32 2, %v653_v40 }
  0x22   :  { %474 = vmatmul.mubr.bf16.vlgmr.msra.gmra.mrb[0].mxu0 %v21_v9 }
  0x23   :  { %513 = vmatprep.mubr.msk.bf16.mxu0 %vm548_vm0, %v547_v0  ;;  %498 = vmatpush3.bf16.msra.mxu0 %v535_v52 }
  0x24   :  { %499 = vmatprep.subr.bf16.mxu0 %v547_v0 }
  0x27   :  { %500 = vmatpush3.bf16.msra.mxu0 %v536_v53 }
  0x28   :  { %501 = vmatprep.subr.bf16.mxu0 %v547_v0 }
  0x2b   :  { %502 = vmatpush3.bf16.msra.mxu0 %v537_v54 }
  0x2c   :  { %503 = vmatprep.subr.bf16.mxu0 %v547_v0 }
  0x2f   :  { %504 = vmatpush3.bf16.msra.mxu0 %v538_v55 }
  0x30   :  { %505 = vmatprep.subr.bf16.mxu0 %v547_v0 }
  0x33   :  { %506 = vmatpush3.bf16.msra.mxu0 %v539_v56 }
  0x34   :  { %507 = vmatprep.subr.bf16.mxu0 %v547_v0 }
  0x37   :  { %508 = vmatpush3.bf16.msra.mxu0 %v540_v57 }
  0x38   :  { %509 = vmatprep.subr.bf16.mxu0 %v547_v0 }
  0x3b   :  { %510 = vmatpush3.bf16.msra.mxu0 %v541_v58 }
  0x3c   :  { %511 = vmatprep.subr.bf16.mxu0 %v547_v0 }
  0x3f   :  { %512 = vmatpush3.bf16.msra.mxu0 %v542_v59 }
  0xf5   :  { %v121_v18 = vpop.f32.mrb[0].mxu0 }
  0xf6   :  { %v127_v19 = vrot.slane %v121_v18, 4  ;;  %v475_v20 = vpop.f32.mrb[1].mxu0 }
  0xf7   :  { %v124_v21 = vpop.f32.mrb[2].mxu0 }
  0xf8   :  { %v128_v22 = vadd.f32 %v127_v19, %v121_v18  ;;  %v476_v23 = vpop.f32.mrb[3].mxu0 }
  0xfa   :  { %v129_v24 = vrot.slane %v128_v22, 2 }
  0xfc   :  { %v130_v25 = vadd.f32 %v129_v24, %v128_v22 }
  0xfe   :  { %v131_v26 = vrot.slane %v130_v25, 1 }
 0x100   :  { %v132_v27 = vadd.f32 %v131_v26, %v130_v25 }
 0x102   :  { %v133_v28 = vmul.f32 0.125, %v132_v27  ;;  %v311_v27 = vsub.s32 4, %v653_v40 }
 0x104   :  { %v134_v29 = vsub.f32 %v121_v18, %v133_v28  ;;  %v288_v18 = vsub.s32 3, %v653_v40  ;;  %v312_v28 = vrot.slane %v658_v41, %v311_v27 }
 0x106   :  { %v135_v30 = vmul.f32 %v134_v29, %v134_v29  ;;  %v289_v22 = vrot.slane %v658_v41, %v288_v18 }
 0x108   :  { %v136_v31 = vrot.slane %v135_v30, 4 }
 0x10a   :  { %v137_v32 = vadd.f32 %v136_v31, %v135_v30 }
 0x10c   :  { %v138_v33 = vrot.slane %v137_v32, 2 }
 0x10e   :  { %v139_v34 = vadd.f32 %v138_v33, %v137_v32 }
 0x110   :  { %v140_v35 = vrot.slane %v139_v34, 1 }
 0x112   :  { %v141_v36 = vadd.f32 %v140_v35, %v139_v34 }
 0x114   :  { %v142_v37 = vmul.f32 0.125, %v141_v36 }
 0x116   :  { %v143_v38 = vadd.f32 1e-05, %v142_v37 }
 0x118   :  { %543 = vrsqrt.f32 %v143_v38 }
 0x122   :  { %v544_v44 = vpop.eup %543 }
 0x123   :  { %v145_v45 = vmul.f32 %v544_v44, %v658_v41 }
 0x125   :  { %v149_v46 = vrot.slane %v145_v45, %v148_v42 }
 0x127   :  { %v150_v48 = vmul.f32 %v149_v46, %v134_v29 }
 0x129   :  { %v155_v49 = vadd.f32 %v154_v47, %v150_v48 }
 0x12b   :  { %v156_v50 = vmax.f32 %v155_v49, 0.0 }
 0x12d   :  { %v157_v51 = vpack.c.bf16 %v156_v50, %v156_v50 }
 0x12f   :  { %494 = vmatmul.mubr.bf16.vlgmr.msra.gmra.mrb[0].mxu1 %v157_v51 }
 0x202   :  { %v256_v60 = vpop.f32.mrb[0].mxu1 }
 0x203   :  { %v262_v61 = vrot.slane %v256_v60, 4  ;;  %v495_v62 = vpop.f32.mrb[1].mxu1 }
 0x204   :  { %v259_v63 = vpop.f32.mrb[2].mxu1 }
 0x205   :  { %v263_v1 = vadd.f32 %v262_v61, %v256_v60  ;;  %v496_v2 = vpop.f32.mrb[3].mxu1 }
 0x207   :  { %v264_v3 = vrot.slane %v263_v1, 2 }
 0x209   :  { %v265_v4 = vadd.f32 %v264_v3, %v263_v1 }
 0x20b   :  { %v266_v5 = vrot.slane %v265_v4, 1 }
 0x20d   :  { %v267_v6 = vadd.f32 %v266_v5, %v265_v4 }
 0x20f   :  { %v268_v7 = vmul.f32 0.125, %v267_v6 }
 0x211   :  { %v269_v8 = vsub.f32 %v256_v60, %v268_v7 }
 0x213   :  { %v270_v9 = vmul.f32 %v269_v8, %v269_v8 }
 0x215   :  { %v271_v10 = vrot.slane %v270_v9, 4 }
 0x217   :  { %v272_v0 = vadd.f32 %v271_v10, %v270_v9 }
 0x219   :  { %v273_v11 = vrot.slane %v272_v0, 2 }
 0x21b   :  { %v274_v12 = vadd.f32 %v273_v11, %v272_v0 }
 0x21d   :  { %v275_v13 = vrot.slane %v274_v12, 1 }
 0x21f   :  { %v276_v14 = vadd.f32 %v275_v13, %v274_v12 }
 0x221   :  { %v277_v15 = vmul.f32 0.125, %v276_v14 }
 0x223   :  { %v278_v16 = vadd.f32 1e-05, %v277_v15 }
 0x225   :  { %545 = vrsqrt.f32 %v278_v16 }
 0x22f   :  { %v546_v19 = vpop.eup %545 }
 0x230   :  { %v280_v20 = vmul.f32 %v546_v19, %v658_v41 }
 0x232   :  { %v284_v21 = vrot.slane %v280_v20, %v283_v17 }
 0x234   :  { %v285_v23 = vmul.f32 %v284_v21, %v269_v8 }
 0x236   :  { %v290_v24 = vadd.f32 %v289_v22, %v285_v23 }
 0x238   :  { %v291_v25 = vmax.f32 %v290_v24, 0.0 }
 0x23a   :  { %v292_v26 = vpack.c.bf16 %v291_v25, %v291_v25 }
 0x23c   :  { %514 = vmatmul.mubr.bf16.vlgmr.msra.gmra.mrb[4].mxu0 %v292_v26 }
 0x30f   :  { %v395_v29 = vpop.f32.mrb[4].mxu0 }
 0x310   :  { %v396_v30 = vadd.f32 %v395_v29, %v312_v28  ;;  %v515_v31 = vpop.f32.mrb[5].mxu0 }
 0x311   :  { %v398_v32 = vpop.f32.mrb[6].mxu0 }
 0x312   :  { %401 = vst [vmem:[%s709_s5] sm:$0xff] %v396_v30  ;;  %v516_v33 = vpop.f32.mrb[7].mxu0 }

</bundles_post_ra>
